<compile_context>
chip_gen: v7x
topology: tpu7x:2x2x1
jax: 0.10.0
libtpu: 0.0.40
codegen_flags: <defaults>
</compile_context>

<pallas_src>
import jax
import jax.numpy as jnp
from jax import lax
from jax.experimental import pallas as pl
from jax.experimental.pallas import tpu as pltpu

BN_EPS = 1e-5


def _batchnorm_train(x):
    """BatchNorm1d(affine=False), training mode: batch mean / biased variance."""
    mean = jnp.mean(x, axis=0, keepdims=True)                     # (1, n)
    var = jnp.mean((x - mean) ** 2, axis=0, keepdims=True)        # (1, n)
    return (x - mean) * lax.rsqrt(var + BN_EPS)                   # (m, n)


def _softcca_kernel(scal_ref, v1_ref, v2_ref, s1_ref, s2_ref, d1_ref, d2_ref,
                    sig1_ref, sig2_ref, l2_ref, sdl_ref):
    # Runtime scalars from SMEM -> no recompile when nf / alpha / lam change.
    alpha1 = scal_ref[0]
    alpha2 = scal_ref[1]
    scale1 = scal_ref[2]   # lam / (nf1 * (n*n - n))
    scale2 = scal_ref[3]   # lam / (nf2 * (n*n - n))

    v1 = v1_ref[...].astype(jnp.float32)
    v2 = v2_ref[...].astype(jnp.float32)
    m, n = v1.shape
    inv_m1 = 1.0 / (m - 1)

    xn1 = _batchnorm_train(v1)
    xn2 = _batchnorm_train(v2)

    # Covariance on the MXU: contract dim 0 of both operands (== xn.T @ xn)
    # without materializing a transposed copy through the XLU.
    dn = (((0,), (0,)), ((), ()))
    if 2 * n <= 128:
        # Small-n fast path: one MXU call covers both views.
        xcat = jnp.concatenate([xn1, xn2], axis=1)                 # (m, 2n)
        cov = lax.dot_general(xcat, xcat, dn,
                              preferred_element_type=jnp.float32) * inv_m1
        new_sigma1 = cov[:n, :n]
        new_sigma2 = cov[n:, n:]
    else:
        new_sigma1 = lax.dot_general(xn1, xn1, dn,
                                     preferred_element_type=jnp.float32) * inv_m1
        new_sigma2 = lax.dot_general(xn2, xn2, dn,
                                     preferred_element_type=jnp.float32) * inv_m1

    sigma1 = alpha1 * s1_ref[...] + new_sigma1                     # (n, n)
    sigma2 = alpha2 * s2_ref[...] + new_sigma2
    sig1_ref[...] = sigma1       # updated EMA buffers (module state out)
    sig2_ref[...] = sigma2

    # Diagonals without any (n,n) iota mask:
    #   diag(new_sigma) = colsum(xn*xn)/(m-1);  diag(sigma_prev) precomputed.
    diag1 = alpha1 * d1_ref[...] + jnp.sum(xn1 * xn1, axis=0, keepdims=True) * inv_m1
    diag2 = alpha2 * d2_ref[...] + jnp.sum(xn2 * xn2, axis=0, keepdims=True) * inv_m1

    # |sigma / nf| summed == sum(|sigma|) / nf  (nf > 0), so nf, lam and
    # 1/(n*n-n) collapse into one scalar multiply.
    sdl1 = (jnp.sum(jnp.abs(sigma1)) - jnp.sum(jnp.abs(diag1))) * scale1
    sdl2 = (jnp.sum(jnp.abs(sigma2)) - jnp.sum(jnp.abs(diag2))) * scale2
    sdl_ref[...] = jnp.concatenate(
        [jnp.full((1, 1), sdl1, jnp.float32),
         jnp.full((1, 1), sdl2, jnp.float32)], axis=1)             # (1, 2)

    # Per-sample MSE over the feature axis.
    l2_ref[...] = jnp.mean((v1 - v2) ** 2, axis=1, keepdims=True)  # (m, 1)


def soft_cca_loss(view1, view2, sigma1_prev, sigma2_prev,
                  *, alpha1, alpha2, norm_factor1_prev, norm_factor2_prev, lam):
    """Forward pass of SoftCCALoss (training-mode step).  Returns a dict with
    the module outputs plus the updated EMA state (sigma / norm_factor)."""
    m, n = view1.shape
    assert view2.shape == (m, n)
    assert m > 1 and n > 1, "SoftCCALoss needs batch > 1 and dimension > 1"

    # Module-state scalar bookkeeping (training step).
    nf1 = alpha1 * norm_factor1_prev + 1.0
    nf2 = alpha2 * norm_factor2_prev + 1.0
    denom = float(n * n - n)

    # All per-step scalars travel as one runtime SMEM operand.
    scalars = jnp.stack([
        jnp.asarray(alpha1, jnp.float32),
        jnp.asarray(alpha2, jnp.float32),
        jnp.asarray(lam, jnp.float32) / (jnp.asarray(nf1, jnp.float32) * denom),
        jnp.asarray(lam, jnp.float32) / (jnp.asarray(nf2, jnp.float32) * denom),
    ])

    sigma1_prev = sigma1_prev.astype(jnp.float32)
    sigma2_prev = sigma2_prev.astype(jnp.float32)
    diag1_prev = jnp.diagonal(sigma1_prev).reshape(1, n)
    diag2_prev = jnp.diagonal(sigma2_prev).reshape(1, n)

    io_bytes = 4 * (2 * m * n + 4 * n * n + 2 * n + m + 16)
    vmem_limit = int(min(48 * 2**20, max(16 * 2**20, 8 * io_bytes)))

    mat_spec = pl.BlockSpec((m, n), lambda i: (0, 0))
    sig_spec = pl.BlockSpec((n, n), lambda i: (0, 0))
    diag_spec = pl.BlockSpec((1, n), lambda i: (0, 0))
    smem_spec = pl.BlockSpec(memory_space=pltpu.MemorySpace.SMEM)

    sigma1_new, sigma2_new, l2, sdl = pl.pallas_call(
        _softcca_kernel,
        out_shape=(
            jax.ShapeDtypeStruct((n, n), jnp.float32),   # updated sigma1
            jax.ShapeDtypeStruct((n, n), jnp.float32),   # updated sigma2
            jax.ShapeDtypeStruct((m, 1), jnp.float32),   # l2 per sample
            jax.ShapeDtypeStruct((1, 2), jnp.float32),   # [sdl1, sdl2]
        ),
        grid=(1,),
        in_specs=[smem_spec, mat_spec, mat_spec, sig_spec, sig_spec,
                  diag_spec, diag_spec],
        out_specs=(sig_spec, sig_spec,
                   pl.BlockSpec((m, 1), lambda i: (0, 0)),
                   pl.BlockSpec((1, 2), lambda i: (0, 0))),
        compiler_params=pltpu.CompilerParams(
            dimension_semantics=("arbitrary",),
            vmem_limit_bytes=vmem_limit),
    )(scalars, view1, view2, sigma1_prev, sigma2_prev, diag1_prev, diag2_prev)

    sdl1 = sdl[0, 0]
    sdl2 = sdl[0, 1]
    l2_vec = l2.reshape(m)
    return {
        "sdl1": jnp.full((m,), sdl1, dtype=jnp.float32),
        "sdl2": jnp.full((m,), sdl2, dtype=jnp.float32),
        "l2": l2_vec,
        "loss": l2_vec + sdl1 + sdl2,
        # Updated module state so the caller can carry the EMA to step t+1.
        "sigma1": sigma1_new,
        "sigma2": sigma2_new,
        "norm_factor1": nf1,
        "norm_factor2": nf2,
    }


if __name__ == "__main__":
    # Small shapes consistent with the module: batch m=8, dimension n=32.
    m, n = 8, 32
    key = jax.random.PRNGKey(0)
    k1, k2 = jax.random.split(key)
    view1 = jax.random.normal(k1, (m, n), dtype=jnp.float32)
    view2 = jax.random.normal(k2, (m, n), dtype=jnp.float32)

    sigma1_prev = jnp.zeros((n, n), dtype=jnp.float32)   # buffers init to zeros
    sigma2_prev = jnp.zeros((n, n), dtype=jnp.float32)
    alpha1 = alpha2 = 0.9
    lam = 0.5

    out = soft_cca_loss(view1, view2, sigma1_prev, sigma2_prev,
                        alpha1=alpha1, alpha2=alpha2,
                        norm_factor1_prev=0.0, norm_factor2_prev=0.0, lam=lam)
    jax.block_until_ready((out["loss"], out["sdl1"], out["sdl2"],
                           out["l2"], out["sigma1"], out["sigma2"]))

    # Pure-JAX reference (same math) for sanity.
    def ref_step(v1, v2, s1p, s2p, a1, a2, nf1p, nf2p, lam_):
        def bn(x):
            mu = x.mean(0, keepdims=True)
            var = ((x - mu) ** 2).mean(0, keepdims=True)
            return (x - mu) / jnp.sqrt(var + BN_EPS)

        def sdl(x, sp, a, nfp):
            xn = bn(x)
            sig = a * sp + xn.T @ xn / (m - 1)
            nf = a * nfp + 1.0
            ab = jnp.abs(sig / nf)
            return (ab.sum() - jnp.trace(ab)) / (n * n - n), sig

        s1, sig1 = sdl(v1, s1p, a1, nf1p)
        s2, sig2 = sdl(v2, s2p, a2, nf2p)
        l2 = ((v1 - v2) ** 2).mean(1)
        return s1 * lam_, s2 * lam_, l2, sig1, sig2

    rs1, rs2, rl2, rsig1, rsig2 = ref_step(
        view1, view2, sigma1_prev, sigma2_prev, alpha1, alpha2, 0.0, 0.0, lam)
    assert jnp.allclose(out["sdl1"], jnp.full((m,), rs1), atol=1e-5, rtol=1e-5)
    assert jnp.allclose(out["sdl2"], jnp.full((m,), rs2), atol=1e-5, rtol=1e-5)
    assert jnp.allclose(out["l2"], rl2, atol=1e-5, rtol=1e-5)
    assert jnp.allclose(out["loss"], rl2 + rs1 + rs2, atol=1e-5, rtol=1e-5)
    assert jnp.allclose(out["sigma1"], rsig1, atol=1e-5, rtol=1e-5)
    assert jnp.allclose(out["sigma2"], rsig2, atol=1e-5, rtol=1e-5)

    # Second training step with a different norm_factor: reuses the SAME
    # compiled kernel (scalars are runtime SMEM inputs) and carries the EMA.
    out2 = soft_cca_loss(view1, view2, out["sigma1"], out["sigma2"],
                         alpha1=alpha1, alpha2=alpha2,
                         norm_factor1_prev=out["norm_factor1"],
                         norm_factor2_prev=out["norm_factor2"], lam=lam)
    jax.block_until_ready((out2["loss"], out2["sdl1"]))

    rs1b, rs2b, rl2b, _, _ = ref_step(
        view1, view2, rsig1, rsig2, alpha1, alpha2, 1.0, 1.0, lam)
    assert jnp.allclose(out2["sdl1"], jnp.full((m,), rs1b), atol=1e-5, rtol=1e-5)
    assert jnp.allclose(out2["sdl2"], jnp.full((m,), rs2b), atol=1e-5, rtol=1e-5)
    assert jnp.allclose(out2["loss"], rl2b + rs1b + rs2b, atol=1e-5, rtol=1e-5)

    print("KERNEL_OK")
</pallas_src>

<mosaic_0001>
module attributes {stable_mosaic.version = 11 : i64} {
  func.func @_softcca_kernel(%arg0: i32, %arg1: memref<4xf32, #tpu.memory_space<smem>>, %arg2: memref<8x32xf32, #tpu.memory_space<vmem>>, %arg3: memref<8x32xf32, #tpu.memory_space<vmem>>, %arg4: memref<32x32xf32, #tpu.memory_space<vmem>>, %arg5: memref<32x32xf32, #tpu.memory_space<vmem>>, %arg6: memref<1x32xf32, #tpu.memory_space<vmem>>, %arg7: memref<1x32xf32, #tpu.memory_space<vmem>>, %arg8: memref<32x32xf32, #tpu.memory_space<vmem>>, %arg9: memref<32x32xf32, #tpu.memory_space<vmem>>, %arg10: memref<8x1xf32, #tpu.memory_space<vmem>>, %arg11: memref<1x2xf32, #tpu.memory_space<vmem>>) attributes {dimension_semantics = [#tpu.dimension_semantics<arbitrary>], iteration_bounds = array<i64: 1>, scalar_prefetch = 0 : i64, scratch_operands = 0 : i64, tpu.core_type = #tpu.core_type<tc>, window_params = [{transform_indices = @transform_0, window_bounds = array<i64: 4>}, {pipeline_mode = #tpu.pipeline_mode<synchronous>, transform_indices = @transform_1, window_bounds = array<i64: 8, 32>}, {pipeline_mode = #tpu.pipeline_mode<synchronous>, transform_indices = @transform_2, window_bounds = array<i64: 8, 32>}, {pipeline_mode = #tpu.pipeline_mode<synchronous>, transform_indices = @transform_3, window_bounds = array<i64: 32, 32>}, {pipeline_mode = #tpu.pipeline_mode<synchronous>, transform_indices = @transform_4, window_bounds = array<i64: 32, 32>}, {pipeline_mode = #tpu.pipeline_mode<synchronous>, transform_indices = @transform_5, window_bounds = array<i64: 1, 32>}, {pipeline_mode = #tpu.pipeline_mode<synchronous>, transform_indices = @transform_6, window_bounds = array<i64: 1, 32>}, {pipeline_mode = #tpu.pipeline_mode<synchronous>, transform_indices = @transform_7, window_bounds = array<i64: 32, 32>}, {pipeline_mode = #tpu.pipeline_mode<synchronous>, transform_indices = @transform_8, window_bounds = array<i64: 32, 32>}, {pipeline_mode = #tpu.pipeline_mode<synchronous>, transform_indices = @transform_9, window_bounds = array<i64: 8, 1>}, {pipeline_mode = #tpu.pipeline_mode<synchronous>, transform_indices = @transform_10, window_bounds = array<i64: 1, 2>}]} {
    %c0 = arith.constant 0 : index
    %0 = memref.load %arg1[%c0] : memref<4xf32, #tpu.memory_space<smem>>
    %c1 = arith.constant 1 : index
    %1 = memref.load %arg1[%c1] : memref<4xf32, #tpu.memory_space<smem>>
    %c2 = arith.constant 2 : index
    %2 = memref.load %arg1[%c2] : memref<4xf32, #tpu.memory_space<smem>>
    %c3 = arith.constant 3 : index
    %3 = memref.load %arg1[%c3] : memref<4xf32, #tpu.memory_space<smem>>
    %c0_0 = arith.constant 0 : index
    %c0_1 = arith.constant 0 : index
    %4 = vector.load %arg2[%c0_0, %c0_1] : memref<8x32xf32, #tpu.memory_space<vmem>>, vector<8x32xf32>
    %c0_2 = arith.constant 0 : index
    %c0_3 = arith.constant 0 : index
    %5 = vector.load %arg3[%c0_2, %c0_3] : memref<8x32xf32, #tpu.memory_space<vmem>>, vector<8x32xf32>
    %cst = arith.constant dense<0.000000e+00> : vector<32xf32>
    %6 = vector.multi_reduction <add>, %4, %cst [0] : vector<8x32xf32> to vector<32xf32>
    %7 = vector.shape_cast %6 : vector<32xf32> to vector<1x32xf32>
    %cst_4 = arith.constant 8.000000e+00 : f32
    %8 = vector.broadcast %cst_4 : f32 to vector<1x32xf32>
    %9 = arith.divf %7, %8 : vector<1x32xf32>
    %10 = vector.broadcast %9 : vector<1x32xf32> to vector<8x32xf32>
    %11 = arith.subf %4, %10 : vector<8x32xf32>
    %12 = arith.mulf %11, %11 : vector<8x32xf32>
    %cst_5 = arith.constant dense<0.000000e+00> : vector<32xf32>
    %13 = vector.multi_reduction <add>, %12, %cst_5 [0] : vector<8x32xf32> to vector<32xf32>
    %14 = vector.shape_cast %13 : vector<32xf32> to vector<1x32xf32>
    %cst_6 = arith.constant 8.000000e+00 : f32
    %15 = vector.broadcast %cst_6 : f32 to vector<1x32xf32>
    %16 = arith.divf %14, %15 : vector<1x32xf32>
    %17 = vector.broadcast %9 : vector<1x32xf32> to vector<8x32xf32>
    %18 = arith.subf %4, %17 : vector<8x32xf32>
    %cst_7 = arith.constant 9.99999974E-6 : f32
    %19 = vector.broadcast %cst_7 : f32 to vector<1x32xf32>
    %20 = arith.addf %16, %19 : vector<1x32xf32>
    %21 = math.rsqrt %20 : vector<1x32xf32>
    %22 = vector.broadcast %21 : vector<1x32xf32> to vector<8x32xf32>
    %23 = arith.mulf %18, %22 : vector<8x32xf32>
    %cst_8 = arith.constant dense<0.000000e+00> : vector<32xf32>
    %24 = vector.multi_reduction <add>, %5, %cst_8 [0] : vector<8x32xf32> to vector<32xf32>
    %25 = vector.shape_cast %24 : vector<32xf32> to vector<1x32xf32>
    %cst_9 = arith.constant 8.000000e+00 : f32
    %26 = vector.broadcast %cst_9 : f32 to vector<1x32xf32>
    %27 = arith.divf %25, %26 : vector<1x32xf32>
    %28 = vector.broadcast %27 : vector<1x32xf32> to vector<8x32xf32>
    %29 = arith.subf %5, %28 : vector<8x32xf32>
    %30 = arith.mulf %29, %29 : vector<8x32xf32>
    %cst_10 = arith.constant dense<0.000000e+00> : vector<32xf32>
    %31 = vector.multi_reduction <add>, %30, %cst_10 [0] : vector<8x32xf32> to vector<32xf32>
    %32 = vector.shape_cast %31 : vector<32xf32> to vector<1x32xf32>
    %cst_11 = arith.constant 8.000000e+00 : f32
    %33 = vector.broadcast %cst_11 : f32 to vector<1x32xf32>
    %34 = arith.divf %32, %33 : vector<1x32xf32>
    %35 = vector.broadcast %27 : vector<1x32xf32> to vector<8x32xf32>
    %36 = arith.subf %5, %35 : vector<8x32xf32>
    %cst_12 = arith.constant 9.99999974E-6 : f32
    %37 = vector.broadcast %cst_12 : f32 to vector<1x32xf32>
    %38 = arith.addf %34, %37 : vector<1x32xf32>
    %39 = math.rsqrt %38 : vector<1x32xf32>
    %40 = vector.broadcast %39 : vector<1x32xf32> to vector<8x32xf32>
    %41 = arith.mulf %36, %40 : vector<8x32xf32>
    %42 = tpu.concatenate %23, %41 in 1 : vector<8x32xf32>, vector<8x32xf32> -> vector<8x64xf32>
    %cst_13 = arith.constant dense<0.000000e+00> : vector<64x64xf32>
    %43 = tpu.matmul %42, %42, %cst_13 {dimension_numbers = #tpu.dot_dimension_numbers<[0], [0], [1], [1], [0, 1, 1, 1], [], []>} : vector<8x64xf32>, vector<8x64xf32>, vector<64x64xf32> -> vector<64x64xf32>
    %cst_14 = arith.constant 0.142857149 : f32
    %44 = vector.broadcast %cst_14 : f32 to vector<64x64xf32>
    %45 = arith.mulf %43, %44 : vector<64x64xf32>
    %46 = vector.extract_strided_slice %45 {offsets = [0, 0], sizes = [32, 32], strides = [1, 1]} : vector<64x64xf32> to vector<32x32xf32>
    %47 = vector.extract_strided_slice %45 {offsets = [32, 32], sizes = [32, 32], strides = [1, 1]} : vector<64x64xf32> to vector<32x32xf32>
    %c0_15 = arith.constant 0 : index
    %c0_16 = arith.constant 0 : index
    %48 = vector.load %arg4[%c0_15, %c0_16] : memref<32x32xf32, #tpu.memory_space<vmem>>, vector<32x32xf32>
    %49 = vector.broadcast %0 : f32 to vector<32x32xf32>
    %50 = arith.mulf %49, %48 : vector<32x32xf32>
    %51 = arith.addf %50, %46 : vector<32x32xf32>
    %c0_17 = arith.constant 0 : index
    %c0_18 = arith.constant 0 : index
    %52 = vector.load %arg5[%c0_17, %c0_18] : memref<32x32xf32, #tpu.memory_space<vmem>>, vector<32x32xf32>
    %53 = vector.broadcast %1 : f32 to vector<32x32xf32>
    %54 = arith.mulf %53, %52 : vector<32x32xf32>
    %55 = arith.addf %54, %47 : vector<32x32xf32>
    %c0_19 = arith.constant 0 : index
    %c0_20 = arith.constant 0 : index
    %56 = vector.load %arg8[%c0_19, %c0_20] : memref<32x32xf32, #tpu.memory_space<vmem>>, vector<32x32xf32>
    tpu.vector_store %arg8[%c0_19, %c0_20], %51 {strides = array<i32>} : memref<32x32xf32, #tpu.memory_space<vmem>>, vector<32x32xf32>,
    %c0_21 = arith.constant 0 : index
    %c0_22 = arith.constant 0 : index
    %57 = vector.load %arg9[%c0_21, %c0_22] : memref<32x32xf32, #tpu.memory_space<vmem>>, vector<32x32xf32>
    tpu.vector_store %arg9[%c0_21, %c0_22], %55 {strides = array<i32>} : memref<32x32xf32, #tpu.memory_space<vmem>>, vector<32x32xf32>,
    %c0_23 = arith.constant 0 : index
    %c0_24 = arith.constant 0 : index
    %58 = vector.load %arg6[%c0_23, %c0_24] : memref<1x32xf32, #tpu.memory_space<vmem>>, vector<1x32xf32>
    %59 = vector.broadcast %0 : f32 to vector<1x32xf32>
    %60 = arith.mulf %59, %58 : vector<1x32xf32>
    %61 = arith.mulf %23, %23 : vector<8x32xf32>
    %cst_25 = arith.constant dense<0.000000e+00> : vector<32xf32>
    %62 = vector.multi_reduction <add>, %61, %cst_25 [0] : vector<8x32xf32> to vector<32xf32>
    %63 = vector.shape_cast %62 : vector<32xf32> to vector<1x32xf32>
    %cst_26 = arith.constant 0.142857149 : f32
    %64 = vector.broadcast %cst_26 : f32 to vector<1x32xf32>
    %65 = arith.mulf %63, %64 : vector<1x32xf32>
    %66 = arith.addf %60, %65 : vector<1x32xf32>
    %c0_27 = arith.constant 0 : index
    %c0_28 = arith.constant 0 : index
    %67 = vector.load %arg7[%c0_27, %c0_28] : memref<1x32xf32, #tpu.memory_space<vmem>>, vector<1x32xf32>
    %68 = vector.broadcast %1 : f32 to vector<1x32xf32>
    %69 = arith.mulf %68, %67 : vector<1x32xf32>
    %70 = arith.mulf %41, %41 : vector<8x32xf32>
    %cst_29 = arith.constant dense<0.000000e+00> : vector<32xf32>
    %71 = vector.multi_reduction <add>, %70, %cst_29 [0] : vector<8x32xf32> to vector<32xf32>
    %72 = vector.shape_cast %71 : vector<32xf32> to vector<1x32xf32>
    %cst_30 = arith.constant 0.142857149 : f32
    %73 = vector.broadcast %cst_30 : f32 to vector<1x32xf32>
    %74 = arith.mulf %72, %73 : vector<1x32xf32>
    %75 = arith.addf %69, %74 : vector<1x32xf32>
    %76 = math.absf %51 : vector<32x32xf32>
    %77 = vector.shape_cast %76 : vector<32x32xf32> to vector<1x32x32xf32>
    %cst_31 = arith.constant dense<0.000000e+00> : vector<1xf32>
    %78 = vector.multi_reduction <add>, %77, %cst_31 [1, 2] : vector<1x32x32xf32> to vector<1xf32>
    %79 = vector.shape_cast %78 : vector<1xf32> to vector<1x1x1xf32>
    %80 = vector.extract %79[0, 0, 0] : f32 from vector<1x1x1xf32>
    %81 = math.absf %66 : vector<1x32xf32>
    %82 = vector.shape_cast %81 : vector<1x32xf32> to vector<1x1x32xf32>
    %cst_32 = arith.constant dense<0.000000e+00> : vector<1xf32>
    %83 = vector.multi_reduction <add>, %82, %cst_32 [1, 2] : vector<1x1x32xf32> to vector<1xf32>
    %84 = vector.shape_cast %83 : vector<1xf32> to vector<1x1x1xf32>
    %85 = vector.extract %84[0, 0, 0] : f32 from vector<1x1x1xf32>
    %86 = arith.subf %80, %85 : f32
    %87 = arith.mulf %86, %2 : f32
    %88 = math.absf %55 : vector<32x32xf32>
    %89 = vector.shape_cast %88 : vector<32x32xf32> to vector<1x32x32xf32>
    %cst_33 = arith.constant dense<0.000000e+00> : vector<1xf32>
    %90 = vector.multi_reduction <add>, %89, %cst_33 [1, 2] : vector<1x32x32xf32> to vector<1xf32>
    %91 = vector.shape_cast %90 : vector<1xf32> to vector<1x1x1xf32>
    %92 = vector.extract %91[0, 0, 0] : f32 from vector<1x1x1xf32>
    %93 = math.absf %75 : vector<1x32xf32>
    %94 = vector.shape_cast %93 : vector<1x32xf32> to vector<1x1x32xf32>
    %cst_34 = arith.constant dense<0.000000e+00> : vector<1xf32>
    %95 = vector.multi_reduction <add>, %94, %cst_34 [1, 2] : vector<1x1x32xf32> to vector<1xf32>
    %96 = vector.shape_cast %95 : vector<1xf32> to vector<1x1x1xf32>
    %97 = vector.extract %96[0, 0, 0] : f32 from vector<1x1x1xf32>
    %98 = arith.subf %92, %97 : f32
    %99 = arith.mulf %98, %3 : f32
    %100 = vector.broadcast %87 : f32 to vector<1x1xf32>
    %101 = vector.broadcast %99 : f32 to vector<1x1xf32>
    %102 = tpu.concatenate %100, %101 in 1 : vector<1x1xf32>, vector<1x1xf32> -> vector<1x2xf32>
    %c0_35 = arith.constant 0 : index
    %c0_36 = arith.constant 0 : index
    %103 = vector.load %arg11[%c0_35, %c0_36] : memref<1x2xf32, #tpu.memory_space<vmem>>, vector<1x2xf32>
    tpu.vector_store %arg11[%c0_35, %c0_36], %102 {strides = array<i32>} : memref<1x2xf32, #tpu.memory_space<vmem>>, vector<1x2xf32>,
    %104 = arith.subf %4, %5 : vector<8x32xf32>
    %105 = arith.mulf %104, %104 : vector<8x32xf32>
    %cst_37 = arith.constant dense<0.000000e+00> : vector<8xf32>
    %106 = vector.multi_reduction <add>, %105, %cst_37 [1] : vector<8x32xf32> to vector<8xf32>
    %107 = vector.shape_cast %106 : vector<8xf32> to vector<8x1xf32>
    %cst_38 = arith.constant 3.200000e+01 : f32
    %108 = vector.broadcast %cst_38 : f32 to vector<8x1xf32>
    %109 = arith.divf %107, %108 : vector<8x1xf32>
    %c0_39 = arith.constant 0 : index
    %c0_40 = arith.constant 0 : index
    %110 = vector.load %arg10[%c0_39, %c0_40] : memref<8x1xf32, #tpu.memory_space<vmem>>, vector<8x1xf32>
    tpu.vector_store %arg10[%c0_39, %c0_40], %109 {strides = array<i32>} : memref<8x1xf32, #tpu.memory_space<vmem>>, vector<8x1xf32>,
    return
  }
  func.func @transform_0(%arg0: i32) -> i32 {
    %c0_i32 = arith.constant 0 : i32
    %c0_i32_0 = arith.constant 0 : i32
    return %c0_i32 : i32
  }
  func.func @transform_1(%arg0: i32) -> (i32, i32) {
    %c0_i32 = arith.constant 0 : i32
    %c0_i32_0 = arith.constant 0 : i32
    %c0_i32_1 = arith.constant 0 : i32
    return %c0_i32, %c0_i32_0 : i32, i32
  }
  func.func @transform_2(%arg0: i32) -> (i32, i32) {
    %c0_i32 = arith.constant 0 : i32
    %c0_i32_0 = arith.constant 0 : i32
    %c0_i32_1 = arith.constant 0 : i32
    return %c0_i32, %c0_i32_0 : i32, i32
  }
  func.func @transform_3(%arg0: i32) -> (i32, i32) {
    %c0_i32 = arith.constant 0 : i32
    %c0_i32_0 = arith.constant 0 : i32
    %c0_i32_1 = arith.constant 0 : i32
    return %c0_i32, %c0_i32_0 : i32, i32
  }
  func.func @transform_4(%arg0: i32) -> (i32, i32) {
    %c0_i32 = arith.constant 0 : i32
    %c0_i32_0 = arith.constant 0 : i32
    %c0_i32_1 = arith.constant 0 : i32
    return %c0_i32, %c0_i32_0 : i32, i32
  }
  func.func @transform_5(%arg0: i32) -> (i32, i32) {
    %c0_i32 = arith.constant 0 : i32
    %c0_i32_0 = arith.constant 0 : i32
    %c0_i32_1 = arith.constant 0 : i32
    return %c0_i32, %c0_i32_0 : i32, i32
  }
  func.func @transform_6(%arg0: i32) -> (i32, i32) {
    %c0_i32 = arith.constant 0 : i32
    %c0_i32_0 = arith.constant 0 : i32
    %c0_i32_1 = arith.constant 0 : i32
    return %c0_i32, %c0_i32_0 : i32, i32
  }
  func.func @transform_7(%arg0: i32) -> (i32, i32) {
    %c0_i32 = arith.constant 0 : i32
    %c0_i32_0 = arith.constant 0 : i32
    %c0_i32_1 = arith.constant 0 : i32
    return %c0_i32, %c0_i32_0 : i32, i32
  }
  func.func @transform_8(%arg0: i32) -> (i32, i32) {
    %c0_i32 = arith.constant 0 : i32
    %c0_i32_0 = arith.constant 0 : i32
    %c0_i32_1 = arith.constant 0 : i32
    return %c0_i32, %c0_i32_0 : i32, i32
  }
  func.func @transform_9(%arg0: i32) -> (i32, i32) {
    %c0_i32 = arith.constant 0 : i32
    %c0_i32_0 = arith.constant 0 : i32
    %c0_i32_1 = arith.constant 0 : i32
    return %c0_i32, %c0_i32_0 : i32, i32
  }
  func.func @transform_10(%arg0: i32) -> (i32, i32) {
    %c0_i32 = arith.constant 0 : i32
    %c0_i32_0 = arith.constant 0 : i32
    %c0_i32_1 = arith.constant 0 : i32
    return %c0_i32, %c0_i32_0 : i32, i32
  }
}

</mosaic_0001>

<bundles_post_ra>
// kernel: tpu_custom_call.1
= control target key start
LH: loop header
LB: loop body
LE: loop exit
PB: predicated region body
PF: predicated region fallthrough
CT: control target
= control target key end

     0   :  { %16 = vsyncpa [#allocation5], 0  ;;  %s1006_s0 = inlined_call_operand.hbm [shape: f32[4], index: 0, kind: input, shape index: {}]   ;;  %s1007_s1 = inlined_call_operand.hbm [shape: f32[8,32], index: 1, kind: input, shape index: {}]   ;;  %s1008_s2 = inlined_call_operand.hbm [shape: f32[8,32], index: 2, kind: input, shape index: {}]   ;;  %s1009_s3 = inlined_call_operand.hbm [shape: f32[32,32], index: 3, kind: input, shape index: {}]   ;;  %s1010_s4 = inlined_call_operand.hbm [shape: f32[32,32], index: 4, kind: input, shape index: {}]   ;;  %s1011_s5 = inlined_call_operand.vmem [shape: f32[1,32], index: 5, kind: input, shape index: {}]   ;;  %s1012_s6 = inlined_call_operand.vmem [shape: f32[1,32], index: 6, kind: input, shape index: {}]   ;;  %s1013_s7 = inlined_call_operand.hbm [shape: f32[32,32], index: 7, kind: output, shape index: {0}]   ;;  %s1014_s8 = inlined_call_operand.hbm [shape: f32[32,32], index: 8, kind: output, shape index: {1}]   ;;  %s1015_s9 = inlined_call_operand.vmem [shape: f32[8,1], index: 9, kind: output, shape index: {2}]   ;;  %s1016_s10 = inlined_call_operand.hbm [shape: f32[1,2], index: 10, kind: output, shape index: {3}]  }
   0x1   :  { %17 = vsyncpa [#allocation3], 0 }
   0x2   :  { %18 = vsyncpa [#allocation8], 0 }
   0x3   :  { %19 = vsyncpa [#allocation11], 0 }
   0x4   :  { %20 = vsyncpa [#allocation4], 0 }
   0x5   :  { %21 = vsyncpa [#allocation14], 0  ;;  %s764_s13 = smov [#allocation7]   ;;  %s765_s15 = smov [#allocation6]  }
   0x6   :  { %s46_s14 = sshll.u32 %s764_s13, 4  ;;  %s36_s16 = sshll.u32 %s765_s15, 4  ;;  %s47_s14 = int_to_ptr.vmem [resolvable:$true] %s46_s14  ;;  %s37_s16 = int_to_ptr.vmem [resolvable:$true] %s36_s16 }
   0x7   :  { %s588_s19 = scalar_lea.hbm %s1008_s2, 128 }
   0x8   :  { %p589_p0 = scmp.ne.s32.totalorder %s1008_s2, %s588_s19  ;;  %p592_p1 = scmp.lt.u32.totalorder %s588_s19, %s1008_s2 }
   0xa   :  { %p594_p2 = pnand %p592_p1, %p589_p0 }
   0xc   :  { %597 = shalt.err (!%p594_p2)
}
   0xd   :  { %s598_s24 = scalar_lea.vmem %s47_s14, 128  ;;  %p603_p4 = scmp.lt.s32.totalorder %s47_s14, %s47_s14 }
   0xe   :  { %p599_p3 = scmp.ne.s32.totalorder %s47_s14, %s598_s24  ;;  %p604_p5 = scmp.lt.s32.totalorder %s598_s24, %s598_s24 }
  0x10   :  { %p605_p6 = por %p604_p5, %p603_p4 }
  0x12   :  { %p606_p7 = pnand %p605_p6, %p599_p3 }
  0x14   :  { %609 = shalt.err (!%p606_p7)
}
  0x15   :  { %49 = dma.hbm_to_vmem [thread:$0]  %s1008_s2, 128, %s47_s14, [#allocation8]  }
  0x16   :  { %s610_s29 = scalar_lea.hbm %s1006_s0, 16 }
  0x17   :  { %p611_p8 = scmp.ne.s32.totalorder %s1006_s0, %s610_s29  ;;  %p614_p9 = scmp.lt.u32.totalorder %s610_s29, %s1006_s0 }
  0x19   :  { %p616_p10 = pnand %p614_p9, %p611_p8 }
  0x1b   :  { %619 = shalt.err (!%p616_p10)
}
  0x1c   :  { %s766_s15 = smov [#allocation2]   ;;  %s620_s19 = scalar_lea.hbm %s1007_s1, 128 }
  0x1d   :  { %29 = dma.hbm_to_smem %s1006_s0, 16, %s766_s15, [#allocation5]  }
  0x1e   :  { %p621_p11 = scmp.ne.s32.totalorder %s1007_s1, %s620_s19  ;;  %p624_p12 = scmp.lt.u32.totalorder %s620_s19, %s1007_s1 }
  0x20   :  { %p626_p13 = pnand %p624_p12, %p621_p11 }
  0x22   :  { %629 = shalt.err (!%p626_p13)
}
  0x23   :  { %s630_s24 = scalar_lea.vmem %s37_s16, 128  ;;  %p635_p1 = scmp.lt.s32.totalorder %s37_s16, %s37_s16 }
  0x24   :  { %p631_p0 = scmp.ne.s32.totalorder %s37_s16, %s630_s24  ;;  %p636_p2 = scmp.lt.s32.totalorder %s630_s24, %s630_s24 }
  0x26   :  { %p637_p3 = por %p636_p2, %p635_p1 }
  0x28   :  { %p638_p4 = pnand %p637_p3, %p631_p0 }
  0x2a   :  { %641 = shalt.err (!%p638_p4)
}
  0x2b   :  { %39 = dma.hbm_to_vmem [thread:$0]  %s1007_s1, 128, %s37_s16, [#allocation3]  }
  0x2c   :  { %s767_s26 = smov [#allocation9]   ;;  %s642_s30 = scalar_lea.hbm %s1009_s3, 512 }
  0x2d   :  { %s55_s27 = sshll.u32 %s767_s26, 4  ;;  %p643_p5 = scmp.ne.s32.totalorder %s1009_s3, %s642_s30  ;;  %s56_s27 = int_to_ptr.vmem [resolvable:$true] %s55_s27 }
  0x2e   :  { %p646_p6 = scmp.lt.u32.totalorder %s642_s30, %s1009_s3 }
  0x30   :  { %p648_p7 = pnand %p646_p6, %p643_p5 }
  0x32   :  { %651 = shalt.err (!%p648_p7)
}
  0x33   :  { %s652_s17 = scalar_lea.vmem %s56_s27, 512  ;;  %p657_p9 = scmp.lt.s32.totalorder %s56_s27, %s56_s27 }
  0x34   :  { %p653_p8 = scmp.ne.s32.totalorder %s56_s27, %s652_s17  ;;  %p658_p10 = scmp.lt.s32.totalorder %s652_s17, %s652_s17 }
  0x36   :  { %p659_p11 = por %p658_p10, %p657_p9 }
  0x38   :  { %p660_p12 = pnand %p659_p11, %p653_p8 }
  0x3a   :  { %663 = shalt.err (!%p660_p12)
}
  0x3b   :  { %s768_s1 = smov 128   ;;  %s769_s16 = smov 8  }
  0x3c   :  { %61 = dma.hbm_to_vmem [thread:$0]  %s1009_s3, 512, %s56_s27, [#allocation8], %s768_s1, %s768_s1, %s769_s16  }
  0x3d   :  { %s770_s14 = smov [#allocation10]   ;;  %s664_s22 = scalar_lea.hbm %s1010_s4, 512 }
  0x3e   :  { %s67_s19 = sshll.u32 %s770_s14, 4  ;;  %p665_p13 = scmp.ne.s32.totalorder %s1010_s4, %s664_s22  ;;  %s68_s19 = int_to_ptr.vmem [resolvable:$true] %s67_s19 }
  0x3f   :  { %p668_p0 = scmp.lt.u32.totalorder %s664_s22, %s1010_s4 }
  0x41   :  { %p670_p1 = pnand %p668_p0, %p665_p13 }
  0x43   :  { %673 = shalt.err (!%p670_p1)
}
  0x44   :  { %s674_s26 = scalar_lea.vmem %s68_s19, 512  ;;  %p679_p3 = scmp.lt.s32.totalorder %s68_s19, %s68_s19 }
  0x45   :  { %p675_p2 = scmp.ne.s32.totalorder %s68_s19, %s674_s26  ;;  %p680_p4 = scmp.lt.s32.totalorder %s674_s26, %s674_s26 }
  0x47   :  { %p681_p5 = por %p680_p4, %p679_p3 }
  0x49   :  { %p682_p6 = pnand %p681_p5, %p675_p2 }
  0x4b   :  { %685 = shalt.err (!%p682_p6)
}
  0x4c   :  { %73 = dma.hbm_to_vmem [thread:$0]  %s1010_s4, 512, %s68_s19, [#allocation11], %s768_s1, %s768_s1, %s769_s16  }
  0x4d   :  { %752 = dma.done.wait [#allocation5], 16  }
  0x4e   :  { %753 = vsyncadd [#allocation5], 4294967280 }
  0x4f   :  { %754 = dma.done.wait [#allocation3], 128  }
  0x50   :  { %755 = vsyncadd [#allocation3], 4294967168 }
  0x51   :  { %756 = dma.done.wait [#allocation8], 640  }
  0x52   :  { %757 = vsyncadd [#allocation8], 4294966656 }
  0x53   :  { %758 = dma.done.wait [#allocation11], 512  }
  0x54   :  { %759 = vsyncadd [#allocation11], 4294966784 }
  0x55   :  { %93 = sfence }
  0x56   :  { %v897_v0 = vld [vmem:[#allocation7] sm:$0xff]  ;;  %vm100_vm0 = vcmask 261120   ;;  %s771_s4 = smov 32   ;;  %v906_v22 = vld [vmem:[#allocation6] sm:$0xff]  ;;  %vm181_vm1 = vcmask 64512   ;;  %s94_s28 = sld [smem:[#allocation2]] }
  0x57   :  { %v123_v1 = vsel %vm100_vm0, %v897_v0, 0.0  ;;  %v101_v23 = vsel %vm100_vm0, %v906_v22, 0.0  ;;  %v369_v60 = vld [vmem:[%s1011_s5] sm:$0x1]  ;;  %vm414_vm2 = vcmask 253952   ;;  %s772_s5 = smov 96  }
  0x58   :  { %v124_v2 = vrot.slane %v123_v1, 4  ;;  %v102_v24 = vrot.slane %v101_v23, 4  ;;  %s527_s11 = sld [smem:[#allocation2 + $0x1]]  ;;  %s774_s17 = smov [#allocation12]  }
  0x59   :  { %s479_s18 = sshll.u32 %s774_s17, 4  ;;  %s952_s18 = int_to_ptr.vmem [resolvable:$true] %s479_s18 }
  0x5a   :  { %v125_v3 = vadd.f32 %v124_v2, %v123_v1  ;;  %v103_v25 = vadd.f32 %v102_v24, %v101_v23 }
  0x5c   :  { %v126_v4 = vrot.slane %v125_v3, 2  ;;  %v104_v26 = vrot.slane %v103_v25, 2  ;;  %v323_v62 = vstv %s94_s28 }
  0x5d   :  { %v370_v63 = vmul.f32 %v369_v60, %v323_v62 }
  0x5e   :  { %v127_v5 = vadd.f32 %v126_v4, %v125_v3  ;;  %v105_v27 = vadd.f32 %v104_v26, %v103_v25 }
  0x60   :  { %v128_v6 = vrot.slane %v127_v5, 1  ;;  %v106_v28 = vrot.slane %v105_v27, 1 }
  0x62   :  { %v129_v7 = vadd.f32 %v128_v6, %v127_v5  ;;  %v107_v29 = vadd.f32 %v106_v28, %v105_v27  ;;  %v320_v6 = vld [vmem:[#allocation9 + $0x8] sm:$0xff] }
  0x64   :  { %v130_v8 = vmul.f32 0.125, %v129_v7  ;;  %v109_v30 = vmul.f32 0.125, %v107_v29  ;;  %v319_v7 = vld [vmem:[#allocation9] sm:$0xff] }
  0x66   :  { %v131_v9 = vsub.f32 %v897_v0, %v130_v8  ;;  %v110_v31 = vsub.f32 %v906_v22, %v109_v30  ;;  %v325_v8 = vmul.f32 %v323_v62, %v320_v6 }
  0x68   :  { %v132_v10 = vmul.f32 %v131_v9, %v131_v9  ;;  %v111_v32 = vmul.f32 %v110_v31, %v110_v31 }
  0x6a   :  { %v133_v11 = vsel %vm100_vm0, %v132_v10, 0.0  ;;  %v112_v33 = vsel %vm100_vm0, %v111_v32, 0.0  ;;  %v324_v10 = vmul.f32 %v323_v62, %v319_v7 }
  0x6b   :  { %v134_v12 = vrot.slane %v133_v11, 4  ;;  %v113_v34 = vrot.slane %v112_v33, 4 }
  0x6d   :  { %v135_v13 = vadd.f32 %v134_v12, %v133_v11  ;;  %v114_v35 = vadd.f32 %v113_v34, %v112_v33 }
  0x6f   :  { %v136_v14 = vrot.slane %v135_v13, 2  ;;  %v115_v36 = vrot.slane %v114_v35, 2 }
  0x71   :  { %v137_v15 = vadd.f32 %v136_v14, %v135_v13  ;;  %v116_v37 = vadd.f32 %v115_v36, %v114_v35 }
  0x73   :  { %v138_v16 = vrot.slane %v137_v15, 1  ;;  %v117_v38 = vrot.slane %v116_v37, 1 }
  0x75   :  { %v139_v17 = vadd.f32 %v138_v16, %v137_v15  ;;  %v118_v39 = vadd.f32 %v117_v38, %v116_v37  ;;  %v322_v16 = vld [vmem:[#allocation9 + $0x18] sm:$0xff] }
  0x77   :  { %v140_v18 = vmul.f32 0.125, %v139_v17  ;;  %v119_v40 = vmul.f32 0.125, %v118_v39 }
  0x79   :  { %v141_v19 = vadd.f32 1e-05, %v140_v18  ;;  %v120_v41 = vadd.f32 1e-05, %v119_v40  ;;  %v321_v18 = vld [vmem:[#allocation9 + $0x10] sm:$0xff] }
  0x7a   :  { %v326_v25 = vmul.f32 %v323_v62, %v321_v18 }
  0x7b   :  { %584 = vrsqrt.f32 %v141_v19 }
  0x7c   :  { %586 = vrsqrt.f32 %v120_v41 }
  0x85   :  { %v585_v20 = vpop.eup %584 }
  0x86   :  { %v903_v21 = vmul.f32 %v585_v20, %v131_v9  ;;  %v587_v42 = vpop.eup %586  ;;  %v327_v20 = vmul.f32 %v323_v62, %v322_v16 }
  0x87   :  { %v122_v43 = vmul.f32 %v587_v42, %v110_v31 }
  0x88   :  { %145 = vrot.lane.b32.xlu0 %v903_v21, %s771_s4 }
  0x89   :  { %v371_v54 = vmul.f32 %v122_v43, %v122_v43 }
  0x8b   :  { %v372_v55 = vsel %vm100_vm0, %v371_v54, 0.0 }
  0x8c   :  { %v373_v56 = vrot.slane %v372_v55, 4 }
  0x8e   :  { %v374_v57 = vadd.f32 %v373_v56, %v372_v55  ;;  %v332_v55 = vld [vmem:[#allocation10] sm:$0xff] }
  0x90   :  { %v375_v58 = vrot.slane %v374_v57, 2 }
  0x92   :  { %v376_v59 = vadd.f32 %v375_v58, %v374_v57 }
  0x94   :  { %v377_v61 = vrot.slane %v376_v59, 1 }
  0x96   :  { %v378_v1 = vadd.f32 %v377_v61, %v376_v59  ;;  %v334_v61 = vld [vmem:[#allocation10 + $0x10] sm:$0xff] }
  0x98   :  { %v379_v2 = vmul.f32 0.14285715, %v378_v1  ;;  %v335_v1 = vld [vmem:[#allocation10 + $0x18] sm:$0xff] }
  0x9a   :  { %v380_v3 = vadd.f32 %v379_v2, %v370_v63 }
  0x9c   :  { %v413_v4 = vand.u32 2147483647, %v380_v3  ;;  %v381_v3 = vld [vmem:[%s1012_s6] sm:$0x1]  ;;  %s773_s6 = smov [#allocation13]  }
  0x9d   :  { %s491_s15 = sshll.u32 %s773_s6, 4  ;;  %s492_s15 = int_to_ptr.vmem [resolvable:$true] %s491_s15 }
  0x9e   :  { %v415_v5 = vsel %vm414_vm2, %v413_v4, 0.0  ;;  %s686_s2 = scalar_lea.vmem %s492_s15, 512  ;;  %p691_p8 = scmp.lt.s32.totalorder %s492_s15, %s492_s15 }
  0x9f   :  { %p687_p7 = scmp.ne.s32.totalorder %s492_s15, %s686_s2  ;;  %p692_p9 = scmp.lt.s32.totalorder %s686_s2, %s686_s2 }
  0xa1   :  { %p693_p10 = por %p692_p9, %p691_p8 }
  0xa3   :  { %p694_p11 = pnand %p693_p10, %p687_p7 }
  0xfa   :  { %v146_v44 = vpop.permute.xlu0 %145 }
  0xfb   :  { %v148_v45 = vsel %vm100_vm0, %v122_v43, %v146_v44 }
  0xfc   :  { %149 = vxpose.xlu0.b32.start.end [1/1] (short) (narrow) %v148_v45, 64  ;;  %547 = vmatprep.subr.mxu0 %v148_v45 }
  0xfd   :  { %561 = vmatprep.subr.mxu1 %v148_v45  ;;  %548 = vmatpush3.msra.mxu0 %v148_v45 }
  0xfe   :  { %562 = vmatpush3.msra.mxu1 %v148_v45 }
 0x145   :  { %416 = vadd.xlane.f32.xlu0 %v415_v5 }
 0x17c   :  { %v165_v46 = vpop.trf.xlu0 }
 0x17d   :  { %549 = vmatprep.mubr.msk.f32.mxu0 %vm181_vm1, %v165_v46 }
 0x180   :  { %v166_v47 = vpop.trf.xlu0 }
 0x181   :  { %550 = vmatmul.mubr.msk.f32.vlgmr.msra.gmra.mrb[0].mxu0 %vm181_vm1, %v166_v47  ;;  %v383_v47 = vmul.f32 %v903_v21, %v903_v21 }
 0x184   :  { %v167_v48 = vpop.trf.xlu0 }
 0x185   :  { %552 = vmatprep.mubr.msk.f32.mxu0 %vm181_vm1, %v167_v48  ;;  %v384_v48 = vsel %vm100_vm0, %v383_v47, 0.0 }
 0x188   :  { %v168_v49 = vpop.trf.xlu0 }
 0x189   :  { %553 = vmatmul.mubr.msk.f32.gmra.mrb[2].mxu0 %vm181_vm1, %v168_v49  ;;  %v385_v49 = vrot.slane %v384_v48, 4 }
 0x18c   :  { %v169_v50 = vpop.trf.xlu0 }
 0x18d   :  { %555 = vmatprep.mubr.msk.f32.mxu1 %vm181_vm1, %v169_v50  ;;  %v386_v50 = vadd.f32 %v385_v49, %v384_v48 }
 0x190   :  { %v170_v51 = vpop.trf.xlu0 }
 0x191   :  { %556 = vmatmul.mubr.msk.f32.vlgmr.msra.gmra.mrb[0].mxu1 %vm181_vm1, %v170_v51  ;;  %v387_v51 = vrot.slane %v386_v50, 2 }
 0x193   :  { %v388_v56 = vadd.f32 %v387_v51, %v386_v50 }
 0x194   :  { %v171_v52 = vpop.trf.xlu0 }
 0x195   :  { %558 = vmatprep.mubr.msk.f32.mxu1 %vm181_vm1, %v171_v52  ;;  %v333_v52 = vld [vmem:[#allocation10 + $0x8] sm:$0xff]  ;;  %v389_v60 = vrot.slane %v388_v56, 1 }
 0x197   :  { %v390_v2 = vadd.f32 %v389_v60, %v388_v56 }
 0x198   :  { %v172_v53 = vpop.trf.xlu0 }
 0x199   :  { %559 = vmatmul.mubr.msk.f32.gmra.mrb[2].mxu1 %vm181_vm1, %v172_v53  ;;  %v336_v53 = vstv %s527_s11 }
 0x19a   :  { %v338_v54 = vmul.f32 %v336_v53, %v333_v52  ;;  %v337_v59 = vmul.f32 %v336_v53, %v332_v55  ;;  %v339_v63 = vmul.f32 %v336_v53, %v334_v61  ;;  %v340_v6 = vmul.f32 %v336_v53, %v335_v1 }
 0x254   :  { %v551_v9 = vpop.f32.mrb[0].mxu0 }
 0x255   :  { %v312_v11 = vmul.f32 0.14285715, %v551_v9  ;;  %v272_v12 = vpop.f32.mrb[1].mxu0  ;;  %v382_v9 = vmul.f32 %v381_v3, %v336_v53 }
 0x256   :  { %v311_v13 = vmul.f32 0.14285715, %v272_v12 }
 0x257   :  { %v329_v14 = vadd.f32 %v325_v8, %v312_v11 }
 0x258   :  { %v328_v15 = vadd.f32 %v324_v10, %v311_v13  ;;  %v391_v10 = vmul.f32 0.14285715, %v390_v2 }
 0x259   :  { %362 = vst.msk [vmem:[#allocation12 + $0x8] sm:$0xff] %vm100_vm0, %v329_v14  ;;  %v394_v17 = vand.u32 2147483647, %v329_v14 }
 0x25a   :  { %361 = vst.msk [vmem:[#allocation12] sm:$0xff] %vm100_vm0, %v328_v15  ;;  %v393_v19 = vand.u32 2147483647, %v328_v15 }
 0x25b   :  { %v398_v23 = vsel %vm100_vm0, %v394_v17, 0.0  ;;  %v392_v17 = vadd.f32 %v391_v10, %v382_v9 }
 0x25c   :  { %v554_v24 = vpop.f32.mrb[2].mxu0  ;;  %v397_v26 = vsel %vm100_vm0, %v393_v19, 0.0 }
 0x25d   :  { %v314_v27 = vmul.f32 0.14285715, %v554_v24  ;;  %v282_v28 = vpop.f32.mrb[3].mxu0  ;;  %v399_v29 = vadd.f32 %v398_v23, %v397_v26  ;;  %v447_v24 = vand.u32 2147483647, %v392_v17 }
 0x25e   :  { %v313_v30 = vmul.f32 0.14285715, %v282_v28 }
 0x25f   :  { %v331_v31 = vadd.f32 %v327_v20, %v314_v27  ;;  %v448_v27 = vsel %vm414_vm2, %v447_v24, 0.0 }
 0x260   :  { %v330_v32 = vadd.f32 %v326_v25, %v313_v30  ;;  %v466_v25 = vsub.f32 %v906_v22, %v897_v0  ;;  %v417_v30 = vpop.xlane.xlu0 %416 }
 0x261   :  { %364 = vst.msk [vmem:[#allocation12 + $0x18] sm:$0xff] %vm100_vm0, %v331_v31  ;;  %v396_v34 = vand.u32 2147483647, %v331_v31  ;;  %v418_v31 = vrot.slane %v417_v30, 4 }
 0x262   :  { %363 = vst.msk [vmem:[#allocation12 + $0x10] sm:$0xff] %vm100_vm0, %v330_v32  ;;  %v395_v33 = vand.u32 2147483647, %v330_v32  ;;  %v467_v28 = vmul.f32 %v466_v25, %v466_v25 }
 0x263   :  { %v402_v40 = vsel %vm100_vm0, %v396_v34, 0.0  ;;  %v419_v32 = vadd.f32 %v418_v31, %v417_v30 }
 0x264   :  { %v557_v35 = vpop.f32.mrb[0].mxu1  ;;  %v400_v36 = vsel %vm100_vm0, %v395_v33, 0.0 }
 0x265   :  { %v316_v37 = vmul.f32 0.14285715, %v557_v35  ;;  %v292_v38 = vpop.f32.mrb[1].mxu1  ;;  %v401_v39 = vadd.f32 %v400_v36, %v399_v29  ;;  %v468_v29 = vsel %vm100_vm0, %v467_v28, 0.0  ;;  %v420_v33 = vrot.slane %v419_v32, 2 }
 0x266   :  { %v315_v42 = vmul.f32 0.14285715, %v292_v38 }
 0x267   :  { %347 = vrot.lane.b32.xlu1 %v316_v37, %s772_s5  ;;  %v403_v41 = vadd.f32 %v402_v40, %v401_v39  ;;  %v421_v36 = vadd.f32 %v420_v33, %v419_v32 }
 0x269   :  { %v422_v39 = vrot.slane %v421_v36, 1 }
 0x26b   :  { %345 = vrot.lane.b32.xlu1 %v315_v42, %s772_s5  ;;  %v423_v40 = vadd.f32 %v422_v39, %v421_v36 }
 0x26c   :  { %v560_v43 = vpop.f32.mrb[2].mxu1 }
 0x26d   :  { %v302_v44 = vpop.f32.mrb[3].mxu1  ;;  %v318_v46 = vmul.f32 0.14285715, %v560_v43 }
 0x26e   :  { %v317_v45 = vmul.f32 0.14285715, %v302_v44 }
 0x270   :  { %349 = vrot.lane.b32.xlu1 %v317_v45, %s772_s5 }
 0x274   :  { %351 = vrot.lane.b32.xlu1 %v318_v46, %s772_s5 }
 0x298   :  { %404 = vadd.xlane.f32.xlu1 %v403_v41 }
 0x2d9   :  { %v348_v57 = vpop.permute.xlu1 %347 }
 0x2da   :  { %v358_v58 = vadd.f32 %v348_v57, %v338_v54 }
 0x2dc   :  { %366 = vst.msk [vmem:[#allocation13 + $0x8] sm:$0xff] %vm100_vm0, %v358_v58  ;;  %v428_v7 = vand.u32 2147483647, %v358_v58 }
 0x2dd   :  { %v346_v62 = vpop.permute.xlu1 %345 }
 0x2de   :  { %v357_v21 = vadd.f32 %v346_v62, %v337_v59  ;;  %v432_v14 = vsel %vm100_vm0, %v428_v7, 0.0 }
 0x2e0   :  { %365 = vst.msk [vmem:[#allocation13] sm:$0xff] %vm100_vm0, %v357_v21  ;;  %v427_v4 = vand.u32 2147483647, %v357_v21 }
 0x2e2   :  { %v350_v5 = vpop.permute.xlu1 %349  ;;  %v431_v11 = vsel %vm100_vm0, %v427_v4, 0.0 }
 0x2e3   :  { %v359_v8 = vadd.f32 %v350_v5, %v339_v63  ;;  %v433_v18 = vadd.f32 %v432_v14, %v431_v11 }
 0x2e5   :  { %367 = vst.msk [vmem:[#allocation13 + $0x10] sm:$0xff] %vm100_vm0, %v359_v8  ;;  %v429_v12 = vand.u32 2147483647, %v359_v8 }
 0x2e6   :  { %v352_v13 = vpop.permute.xlu1 %351 }
 0x2e7   :  { %v360_v15 = vadd.f32 %v352_v13, %v340_v6  ;;  %v434_v16 = vsel %vm100_vm0, %v429_v12, 0.0 }
 0x2e8   :  { %v435_v20 = vadd.f32 %v434_v16, %v433_v18 }
 0x2e9   :  { %368 = vst.msk [vmem:[#allocation13 + $0x18] sm:$0xff] %vm100_vm0, %v360_v15  ;;  %v430_v19 = vand.u32 2147483647, %v360_v15 }
 0x2eb   :  { %v436_v23 = vsel %vm100_vm0, %v430_v19, 0.0 }
 0x2ec   :  { %v437_v26 = vadd.f32 %v436_v23, %v435_v20 }
 0x2ee   :  { %438 = vadd.xlane.f32.xlu1 %v437_v26 }
 0x2f2   :  { %449 = vadd.xlane.f32.xlu1 %v448_v27 }
 0x2f6   :  { %469 = vadd.xlane.f32.xlu1 %v468_v29 }
 0x325   :  { %v405_v34 = vpop.xlane.xlu1 %404 }
 0x326   :  { %v406_v35 = vrot.slane %v405_v34, 4 }
 0x328   :  { %v407_v37 = vadd.f32 %v406_v35, %v405_v34 }
 0x32a   :  { %v408_v38 = vrot.slane %v407_v37, 2 }
 0x32c   :  { %v409_v0 = vadd.f32 %v408_v38, %v407_v37 }
 0x32e   :  { %v410_v22 = vrot.slane %v409_v0, 1 }
 0x330   :  { %v411_v41 = vadd.f32 %v410_v22, %v409_v0 }
 0x332   :  { %563 = vpush %v411_v41 }
 0x333   :  { %565 = vpush %v423_v40 }
 0x334   :  { %697 = shalt.err (!%p694_p11)
}
 0x335   :  { %s698_s20 = scalar_lea.hbm %s1014_s8, 512 }
 0x336   :  { %p699_p12 = scmp.ne.s32.totalorder %s1014_s8, %s698_s20  ;;  %p702_p13 = scmp.lt.u32.totalorder %s698_s20, %s1014_s8 }
 0x338   :  { %p704_p0 = pnand %p702_p13, %p699_p12 }
 0x33a   :  { %707 = shalt.err (!%p704_p0)
}
 0x33b   :  { %497 = dma.vmem_to_hbm [thread:$0]  %s492_s15, 512, %s1014_s8, [#allocation14], %s768_s1, %s768_s1, %s769_s16  }
 0x33c   :  { %s708_s26 = scalar_lea.vmem %s952_s18, 512  ;;  %p713_p2 = scmp.lt.s32.totalorder %s952_s18, %s952_s18 }
 0x33d   :  { %p709_p1 = scmp.ne.s32.totalorder %s952_s18, %s708_s26  ;;  %p714_p3 = scmp.lt.s32.totalorder %s708_s26, %s708_s26 }
 0x33f   :  { %p715_p4 = por %p714_p3, %p713_p2 }
 0x341   :  { %p716_p5 = pnand %p715_p4, %p709_p1 }
 0x343   :  { %719 = shalt.err (!%p716_p5)
}
 0x344   :  { %s720_s4 = scalar_lea.hbm %s1013_s7, 512 }
 0x345   :  { %p721_p6 = scmp.ne.s32.totalorder %s1013_s7, %s720_s4  ;;  %p724_p7 = scmp.lt.u32.totalorder %s720_s4, %s1013_s7 }
 0x347   :  { %p726_p8 = pnand %p724_p7, %p721_p6 }
 0x349   :  { %729 = shalt.err (!%p726_p8)
}
 0x34a   :  { %485 = dma.vmem_to_hbm [thread:$0]  %s952_s18, 512, %s1013_s7, [#allocation4], %s768_s1, %s768_s1, %s769_s16   ;;  %vm462_vm3 = vcmask 7168   ;;  %vm464_vm4 = vcmask 8192  }
 0x34b   :  { %s528_s1 = sld [smem:[#allocation2 + $0x2]]  ;;  %s529_s6 = sld [smem:[#allocation2 + $0x3]] }
 0x34c   :  { %s775_s19 = smov [#allocation15]  }
 0x34d   :  { %s506_s20 = sshll.u32 %s775_s19, 4  ;;  %s507_s20 = int_to_ptr.vmem [resolvable:$true] %s506_s20 }
 0x34e   :  { %s734_s22 = scalar_lea.vmem %s507_s20, 32  ;;  %p735_p10 = scmp.lt.s32.totalorder %s507_s20, %s507_s20 }
 0x363   :  { %s564_s7 = spop %563 }
 0x364   :  { %s566_s16 = spop %565 }
 0x365   :  { %s425_s15 = ssub.f32 %s564_s7, %s566_s16 }
 0x367   :  { %s426_s2 = smul.f32 %s528_s1, %s425_s15 }
 0x369   :  { %v460_v58 = vstv %s426_s2 }
 0x37b   :  { %v439_v42 = vpop.xlane.xlu1 %438 }
 0x37c   :  { %v440_v43 = vrot.slane %v439_v42, 4 }
 0x37e   :  { %v441_v44 = vadd.f32 %v440_v43, %v439_v42 }
 0x37f   :  { %v450_v45 = vpop.xlane.xlu1 %449 }
 0x380   :  { %v442_v46 = vrot.slane %v441_v44, 2  ;;  %v451_v47 = vrot.slane %v450_v45, 4 }
 0x382   :  { %v452_v48 = vadd.f32 %v451_v47, %v450_v45  ;;  %v443_v49 = vadd.f32 %v442_v46, %v441_v44 }
 0x383   :  { %v470_v50 = vpop.xlane.xlu1 %469 }
 0x384   :  { %v453_v51 = vrot.slane %v452_v48, 2  ;;  %v444_v52 = vrot.slane %v443_v49, 1  ;;  %v472_v53 = vmul.f32 0.03125, %v470_v50 }
 0x386   :  { %v445_v54 = vadd.f32 %v444_v52, %v443_v49  ;;  %v454_v55 = vadd.f32 %v453_v51, %v452_v48  ;;  %473 = vst.msk [vmem:[%s1015_s9] sm:$0xff] %vm462_vm3, %v472_v53  ;;  %s730_s9 = scalar_lea.vmem %s507_s20, 16 }
 0x387   :  { %p731_p9 = scmp.ne.s32.totalorder %s507_s20, %s730_s9  ;;  %p736_p11 = scmp.lt.s32.totalorder %s734_s22, %s730_s9 }
 0x388   :  { %567 = vpush %v445_v54  ;;  %v455_v56 = vrot.slane %v454_v55, 1 }
 0x389   :  { %p737_p12 = por %p736_p11, %p735_p10 }
 0x38a   :  { %v456_v57 = vadd.f32 %v455_v56, %v454_v55 }
 0x38b   :  { %p738_p13 = pnand %p737_p12, %p731_p9 }
 0x38c   :  { %569 = vpush %v456_v57 }
 0x3b9   :  { %s568_s17 = spop %567 }
 0x3bd   :  { %s570_s18 = spop %569 }
 0x3be   :  { %s458_s14 = ssub.f32 %s568_s17, %s570_s18 }
 0x3c0   :  { %s459_s21 = smul.f32 %s529_s6, %s458_s14 }
 0x3c2   :  { %v461_v59 = vstv %s459_s21 }
 0x3c3   :  { %v463_v60 = vsel %vm462_vm3, %v460_v58, %v461_v59 }
 0x3c4   :  { %465 = vst.msk [vmem:[#allocation15] sm:$0x1] %vm464_vm4, %v463_v60 }
 0x3c5   :  { %741 = shalt.err (!%p738_p13)
}
 0x3c6   :  { %s742_s0 = scalar_lea.hbm %s1016_s10, 16 }
 0x3c7   :  { %p743_p0 = scmp.ne.s32.totalorder %s1016_s10, %s742_s0  ;;  %p746_p1 = scmp.lt.u32.totalorder %s742_s0, %s1016_s10 }
 0x3c9   :  { %p748_p2 = pnand %p746_p1, %p743_p0 }
 0x3cb   :  { %751 = shalt.err (!%p748_p2)
}
 0x3cc   :  { %509 = dma.vmem_to_hbm [thread:$0]  %s507_s20, 16, %s1016_s10, [#allocation14]  }
 0x3cd   :  { %760 = dma.done.wait [#allocation4], 512  }
 0x3ce   :  { %761 = vsyncadd [#allocation4], 4294966784 }
 0x3cf   :  { %762 = dma.done.wait [#allocation14], 528  }
 0x3d0   :  { %763 = vsyncadd [#allocation14], 4294966768 }
 0x3d1   :  { %521 = vsyncpa [#allocation3], 1 }
 0x3d2   :  { %522 = vsyncpa [#allocation8], 1 }
 0x3d3   :  { %523 = vsyncpa [#allocation11], 1 }
 0x3d4   :  { %524 = vsyncpa [#allocation4], 1 }
 0x3d5   :  { %525 = vsyncpa [#allocation14], 1 }
 0x3d6   :  { %526 = vsyncpa [#allocation5], 1 }

</bundles_post_ra>
